<compile_context>
chip_gen: v6e
topology: v6e:2x2x1
jax: 0.10.0
libtpu: 0.0.40
codegen_flags: <defaults>
</compile_context>

<pallas_src>
import functools
import math

import jax
import jax.numpy as jnp
from jax import lax
from jax.experimental import pallas as pl
from jax.experimental.pallas import tpu as pltpu


# ----------------------------------------------------------------------------
# Hardware / tiling helpers
# ----------------------------------------------------------------------------
def _vmem_capacity_bytes():
    """Per-core VMEM capacity; conservative 64 MiB fallback (v7x minimum)."""
    cap = 64 << 20
    try:
        info = pltpu.get_tpu_info()
        cap = int(getattr(info, "vmem_capacity_bytes", cap)) or cap
    except Exception:
        pass
    return max(cap, 32 << 20)


def _pick_row_split(batch, n_flat):
    """Split each batch row into G sub-rows so (batch*G) % 8 == 0 (sublane-dense
    vregs) while keeping the reshape a free row-major view (G must divide N)."""
    base = 8 // math.gcd(batch, 8)
    if base == 1:
        return 1
    for mult in (1, 2, 4, 8):
        g = base * mult
        if n_flat % g == 0:
            return g
    return 1


def _pick_tile(n_cols, n_rows, n_streams, itemsize, budget_bytes):
    """Largest lane-aligned column tile whose double-buffered input blocks plus
    the f32 scratch accumulator fit inside `budget_bytes` of VMEM."""
    per_col = n_rows * (2 * n_streams * itemsize + 4)   # dbl-buffered inputs + scratch
    max_tile = max(128, budget_bytes // per_col)
    if n_cols <= max_tile:
        return n_cols
    tile = max(128, (max_tile // 128) * 128)
    if n_cols % 128 == 0:
        # Prefer an exactly dividing, lane-aligned tile when one exists nearby
        # (avoids partially out-of-bounds edge blocks entirely).
        t = tile
        while t >= max(128, tile // 2):
            if n_cols % t == 0:
                return t
            t -= 128
    return tile


# ----------------------------------------------------------------------------
# Fused loss kernel
# ----------------------------------------------------------------------------
def _fused_loss_kernel(n_iters, tile, steps_per_chunk, *refs):
    """grid = (P, S): axis 0 splits the flattened mel columns into P independent
    chunks ('parallel' -> one per TensorCore on v7x); axis 1 walks the column
    tiles of one chunk ('arbitrary', reduction into the VMEM scratch).

    refs = (thresh,                       # (R, 128) int32, lane-broadcast, resident
            mel_tgt, mel_iter_0..I-1,     # (R, tile) native dtype, streamed
            dur_pred, dur_tgt, src_mask, score_soft, score_hard,   # tiny, resident
            out,                          # (1, 8, 128) f32 per-chunk partials
            acc)                          # (R, tile) f32 scratch accumulator
    """
    thresh_ref = refs[0]
    tgt_ref = refs[1]
    iter_refs = refs[2:2 + n_iters]
    (dur_pred_ref, dur_tgt_ref, src_mask_ref,
     soft_ref, hard_ref) = refs[2 + n_iters:7 + n_iters]
    out_ref = refs[7 + n_iters]
    acc_ref = refs[8 + n_iters]

    p = pl.program_id(0)
    s = pl.program_id(1)

    @pl.when(s == 0)
    def _():
        acc_ref[...] = jnp.zeros_like(acc_ref)

    # Hot path: masked |pred - target| accumulated with pure vector adds
    # (no per-step cross-lane reduce, no per-step scalar RMW).
    rows = tgt_ref.shape[0]
    col0 = (p * steps_per_chunk + s) * tile                 # logical global column
    col = lax.broadcasted_iota(jnp.int32, (rows, tile), 1) + col0
    valid = col < thresh_ref[...][:, :1]                    # per-row valid prefix
    tgt = tgt_ref[...].astype(jnp.float32)
    for it_ref in iter_refs:                                # I is small; unrolled
        diff = jnp.abs(it_ref[...].astype(jnp.float32) - tgt)
        acc_ref[...] += jnp.where(valid, diff, 0.0)

    @pl.when(s == steps_per_chunk - 1)
    def _():
        # Single cross-lane/sublane reduce per chunk.
        mel_abs = jnp.sum(acc_ref[...])

        # Tiny side losses (resident blocks; recomputed per chunk - negligible).
        m = src_mask_ref[...]
        d = jnp.where(m > 0.5, dur_pred_ref[...] - dur_tgt_ref[...], 0.0)
        dur_sq = jnp.sum(d * d)
        dur_cnt = jnp.sum(m)

        prob = soft_ref[...].astype(jnp.float32)
        tgt_h = hard_ref[...].astype(jnp.float32)
        log_p = jnp.maximum(jnp.log(prob), -100.0)          # PyTorch BCE log clamp
        log_1mp = jnp.maximum(jnp.log(1.0 - prob), -100.0)
        bce = jnp.sum(-(tgt_h * log_p + (1.0 - tgt_h) * log_1mp))

        row = lax.broadcasted_iota(jnp.int32, (8, 128), 0)
        packed = jnp.where(row == 0, mel_abs,
                 jnp.where(row == 1, dur_sq,
                 jnp.where(row == 2, dur_cnt,
                 jnp.where(row == 3, bce, 0.0))))
        out_ref[0] = packed


def _fused_loss_sums(thresh_lane, tgt_rs, iters_rs, dur_pred, dur_tgt, src_mask_f,
                     score_soft, score_hard):
    R, C = tgt_rs.shape
    n_iters = len(iters_rs)
    itemsize = max(jnp.dtype(a.dtype).itemsize for a in (tgt_rs, *iters_rs))

    cap = _vmem_capacity_bytes()
    budget = min(int(cap * 0.45), 96 << 20)
    vmem_limit = min(int(cap * 0.75), 120 << 20)

    tile = _pick_tile(C, R, n_iters + 1, itemsize, budget)
    n_blocks = -(-C // tile)
    n_chunks = 2 if n_blocks >= 2 else 1        # leading 'parallel' axis (v7x: 2 TCs)
    steps = -(-n_blocks // n_chunks)
    last_block = n_blocks - 1

    def col_map(p, s):
        # Clamp so overflow/edge steps re-read a real block; the in-kernel
        # threshold mask zeroes every column beyond the valid data anyway.
        return (0, jnp.minimum(p * steps + s, last_block))

    def const_map(p, s):
        return (0, 0)

    mel_specs = [pl.BlockSpec((R, tile), col_map) for _ in range(n_iters + 1)]
    in_specs = ([pl.BlockSpec((R, 128), const_map)]          # lane-dense thresholds
                + mel_specs
                + [pl.BlockSpec(dur_pred.shape, const_map),
                   pl.BlockSpec(dur_tgt.shape, const_map),
                   pl.BlockSpec(src_mask_f.shape, const_map),
                   pl.BlockSpec(score_soft.shape, const_map),
                   pl.BlockSpec(score_hard.shape, const_map)])

    kernel = functools.partial(_fused_loss_kernel, n_iters, tile, steps)
    out = pl.pallas_call(
        kernel,
        out_shape=jax.ShapeDtypeStruct((n_chunks, 8, 128), jnp.float32),
        grid=(n_chunks, steps),
        in_specs=in_specs,
        out_specs=pl.BlockSpec((1, 8, 128), lambda p, s: (p, 0, 0)),
        scratch_shapes=[pltpu.VMEM((R, tile), jnp.float32)],
        compiler_params=pltpu.CompilerParams(
            dimension_semantics=("parallel", "arbitrary"),
            vmem_limit_bytes=vmem_limit,
        ),
    )(thresh_lane, tgt_rs, *iters_rs,
      dur_pred, dur_tgt, src_mask_f, score_soft, score_hard)

    mel_abs = jnp.sum(out[:, 0, 0])             # sum per-chunk partials
    dur_sq = out[0, 1, 0]
    dur_cnt = out[0, 2, 0]
    bce = out[0, 3, 0]
    return mel_abs, dur_sq, dur_cnt, bce


# ----------------------------------------------------------------------------
# Forward pass (mirrors XSpkEmoTransLoss.forward)
# ----------------------------------------------------------------------------
def xspk_emo_trans_loss(inputs, predictions, alpha, beta):
    mel_targets, _, _, duration_targets, *_ = inputs[6:]
    (mel_iters, score_hard, score_soft, log_duration_predictions, _,
     src_masks, mel_masks, _, mel_lens) = predictions

    src_valid = jnp.logical_not(src_masks)          # True == keep
    mel_valid = jnp.logical_not(mel_masks)          # True == keep
    B, T = mel_valid.shape
    M = mel_targets.shape[-1]
    n_iters = len(mel_iters)
    N = T * M

    # Sublane-dense, lane-major reshape (free row-major view, no HBM copy).
    G = _pick_row_split(B, N)
    R, C = B * G, N // G
    tgt_rs = mel_targets[:, :T, :].reshape(R, C)
    iters_rs = [m[:, :T, :].reshape(R, C) for m in mel_iters]

    # Per-sub-row valid-prefix threshold (mel mask is a length/prefix mask).
    valid_frames = jnp.sum(mel_valid, axis=1, dtype=jnp.int32)      # (B,)
    thresh_b = valid_frames * M                                     # (B,)
    g_off = jnp.arange(G, dtype=jnp.int32) * C                      # (G,)
    thresh_rows = jnp.clip(thresh_b[:, None] - g_off[None, :], 0, C).reshape(R)
    thresh_lane = jnp.broadcast_to(thresh_rows[:, None], (R, 128)).astype(jnp.int32)

    # The mask count is identical for every refinement iteration: compute once.
    mel_count = jnp.sum(valid_frames).astype(jnp.float32) * M

    log_dur_tgt = jnp.log(duration_targets.astype(jnp.float32) + 1.0)
    src_mask_f = src_valid.astype(jnp.float32)

    mel_abs, dur_sq, dur_cnt, bce_total = _fused_loss_sums(
        thresh_lane, tgt_rs, iters_rs,
        log_duration_predictions.astype(jnp.float32), log_dur_tgt, src_mask_f,
        score_soft.astype(jnp.float32), score_hard.astype(jnp.float32))

    # sum_i MAE_i == (sum_i abs_sum_i) / count   (count is iteration-invariant)
    mel_iter_loss_total = mel_abs / mel_count
    mel_loss = jnp.mean(mel_iter_loss_total / (n_iters * mel_lens.astype(jnp.float32)))
    duration_loss = dur_sq / dur_cnt
    emotion_classifier_loss = bce_total / float(score_soft.size)

    total_loss = mel_loss + alpha * emotion_classifier_loss + beta * duration_loss
    return total_loss, mel_loss, emotion_classifier_loss, duration_loss


# ----------------------------------------------------------------------------
# Pure-JAX reference (for correctness check)
# ----------------------------------------------------------------------------
def reference_loss(inputs, predictions, alpha, beta):
    mel_targets, _, _, duration_targets, *_ = inputs[6:]
    (mel_iters, score_hard, score_soft, log_dur_pred, _,
     src_masks, mel_masks, _, mel_lens) = predictions
    src_valid = jnp.logical_not(src_masks)
    mel_valid = jnp.logical_not(mel_masks)
    log_dur_tgt = jnp.log(duration_targets.astype(jnp.float32) + 1.0)
    T = mel_valid.shape[1]
    mel_tgt = mel_targets[:, :T, :].astype(jnp.float32)
    mmask = mel_valid[:, :, None].astype(jnp.float32)
    cnt = jnp.sum(mmask) * mel_tgt.shape[-1]
    S = 0.0
    for it in mel_iters:
        S = S + jnp.sum(jnp.abs(it.astype(jnp.float32) - mel_tgt) * mmask) / cnt
    mel_loss = jnp.mean(S / (len(mel_iters) * mel_lens.astype(jnp.float32)))
    sm = src_valid.astype(jnp.float32)
    dur_loss = jnp.sum(((log_dur_pred - log_dur_tgt) * sm) ** 2) / jnp.sum(sm)
    p, t = score_soft, score_hard
    bce = jnp.mean(-(t * jnp.maximum(jnp.log(p), -100.0)
                     + (1.0 - t) * jnp.maximum(jnp.log(1.0 - p), -100.0)))
    total = mel_loss + alpha * bce + beta * dur_loss
    return total, mel_loss, bce, dur_loss


# ----------------------------------------------------------------------------
# Main
# ----------------------------------------------------------------------------
if __name__ == "__main__":
    key = jax.random.PRNGKey(0)
    B, T_mel, n_mels, T_src, I, n_emotions = 2, 16, 8, 8, 3, 4
    alpha, beta = 0.1, 1.0   # loss hyper-params from train_config (synthetic)

    keys = jax.random.split(key, 8)
    mel_targets = jax.random.normal(keys[0], (B, T_mel, n_mels), dtype=jnp.float32)
    mel_iters = [
        jax.random.normal(keys[1], (B, T_mel, n_mels), dtype=jnp.float32),
        jax.random.normal(keys[2], (B, T_mel, n_mels), dtype=jnp.float32),
        jax.random.normal(keys[3], (B, T_mel, n_mels), dtype=jnp.float32),
    ][:I]
    duration_targets = jax.random.randint(keys[4], (B, T_src), 1, 6).astype(jnp.int32)
    log_duration_predictions = jax.random.normal(keys[5], (B, T_src), dtype=jnp.float32)
    score_soft = jax.nn.sigmoid(jax.random.normal(keys[6], (B, n_emotions), dtype=jnp.float32))
    score_hard = jax.nn.one_hot(jnp.array([1, 3]), n_emotions, dtype=jnp.float32)

    mel_lens = jnp.array([16, 12], dtype=jnp.int32)
    src_lens = jnp.array([8, 6], dtype=jnp.int32)
    # PyTorch convention: mask is True where padded (forward inverts it)
    mel_masks = jnp.arange(T_mel)[None, :] >= mel_lens[:, None]
    src_masks = jnp.arange(T_src)[None, :] >= src_lens[:, None]

    inputs = (0, 0, 0, 0, 0, 0, mel_targets, 0, 0, duration_targets)
    predictions = (mel_iters, score_hard, score_soft, log_duration_predictions, 0,
                   src_masks, mel_masks, 0, mel_lens)

    out = xspk_emo_trans_loss(inputs, predictions, alpha, beta)
    out = jax.block_until_ready(out)

    ref = reference_loss(inputs, predictions, alpha, beta)
    ref = jax.block_until_ready(ref)

    import numpy as np
    for got, exp in zip(out, ref):
        np.testing.assert_allclose(np.asarray(got), np.asarray(exp), rtol=1e-5, atol=1e-5)

    print("KERNEL_OK")
</pallas_src>

<mosaic_0001>
module attributes {stable_mosaic.version = 11 : i64} {
  func.func @_fused_loss_kernel(%arg0: i32, %arg1: i32, %arg2: memref<8x128xi32, #tpu.memory_space<vmem>>, %arg3: memref<8x32xf32, #tpu.memory_space<vmem>>, %arg4: memref<8x32xf32, #tpu.memory_space<vmem>>, %arg5: memref<8x32xf32, #tpu.memory_space<vmem>>, %arg6: memref<8x32xf32, #tpu.memory_space<vmem>>, %arg7: memref<2x8xf32, #tpu.memory_space<vmem>>, %arg8: memref<2x8xf32, #tpu.memory_space<vmem>>, %arg9: memref<2x8xf32, #tpu.memory_space<vmem>>, %arg10: memref<2x4xf32, #tpu.memory_space<vmem>>, %arg11: memref<2x4xf32, #tpu.memory_space<vmem>>, %arg12: memref<1x8x128xf32, #tpu.memory_space<vmem>>, %arg13: memref<8x32xf32, #tpu.memory_space<vmem>>) attributes {dimension_semantics = [#tpu.dimension_semantics<parallel>, #tpu.dimension_semantics<arbitrary>], iteration_bounds = array<i64: 1, 1>, scalar_prefetch = 0 : i64, scratch_operands = 1 : i64, tpu.core_type = #tpu.core_type<tc>, window_params = [{pipeline_mode = #tpu.pipeline_mode<synchronous>, transform_indices = @transform_0, window_bounds = array<i64: 8, 128>}, {transform_indices = @transform_1, window_bounds = array<i64: 8, 32>}, {transform_indices = @transform_2, window_bounds = array<i64: 8, 32>}, {transform_indices = @transform_3, window_bounds = array<i64: 8, 32>}, {transform_indices = @transform_4, window_bounds = array<i64: 8, 32>}, {pipeline_mode = #tpu.pipeline_mode<synchronous>, transform_indices = @transform_5, window_bounds = array<i64: 2, 8>}, {pipeline_mode = #tpu.pipeline_mode<synchronous>, transform_indices = @transform_6, window_bounds = array<i64: 2, 8>}, {pipeline_mode = #tpu.pipeline_mode<synchronous>, transform_indices = @transform_7, window_bounds = array<i64: 2, 8>}, {pipeline_mode = #tpu.pipeline_mode<synchronous>, transform_indices = @transform_8, window_bounds = array<i64: 2, 4>}, {pipeline_mode = #tpu.pipeline_mode<synchronous>, transform_indices = @transform_9, window_bounds = array<i64: 2, 4>}, {transform_indices = @transform_10, window_bounds = array<i64: 1, 8, 128>}]} {
    %c0_i32 = arith.constant 0 : i32
    %0 = arith.cmpi eq, %arg1, %c0_i32 : i32
    %1 = arith.extui %0 : i1 to i32
    %c0_i32_0 = arith.constant 0 : i32
    %2 = arith.cmpi ne, %1, %c0_i32_0 : i32
    scf.if %2 {
      %cst_26 = arith.constant 0.000000e+00 : f32
      %41 = vector.broadcast %cst_26 : f32 to vector<8x32xf32>
      %c0_27 = arith.constant 0 : index
      %c0_28 = arith.constant 0 : index
      %42 = vector.load %arg13[%c0_27, %c0_28] : memref<8x32xf32, #tpu.memory_space<vmem>>, vector<8x32xf32>
      tpu.vector_store %arg13[%c0_27, %c0_28], %41 {strides = array<i32>} : memref<8x32xf32, #tpu.memory_space<vmem>>, vector<8x32xf32>,
    } else {
    }
    %c1_i32 = arith.constant 1 : i32
    %3 = arith.muli %arg0, %c1_i32 : i32
    %4 = arith.addi %3, %arg1 : i32
    %c32_i32 = arith.constant 32 : i32
    %5 = arith.muli %4, %c32_i32 : i32
    %6 = tpu.iota {dimensions = array<i32: 1>} : vector<8x32xi32>
    %7 = vector.broadcast %5 : i32 to vector<8x32xi32>
    %8 = arith.addi %6, %7 : vector<8x32xi32>
    %c0 = arith.constant 0 : index
    %c0_1 = arith.constant 0 : index
    %9 = vector.load %arg2[%c0, %c0_1] : memref<8x128xi32, #tpu.memory_space<vmem>>, vector<8x128xi32>
    %10 = vector.extract_strided_slice %9 {offsets = [0, 0], sizes = [8, 1], strides = [1, 1]} : vector<8x128xi32> to vector<8x1xi32>
    %11 = vector.broadcast %10 : vector<8x1xi32> to vector<8x32xi32>
    %12 = arith.cmpi slt, %8, %11 : vector<8x32xi32>
    %c0_2 = arith.constant 0 : index
    %c0_3 = arith.constant 0 : index
    %13 = vector.load %arg3[%c0_2, %c0_3] : memref<8x32xf32, #tpu.memory_space<vmem>>, vector<8x32xf32>
    %c0_4 = arith.constant 0 : index
    %c0_5 = arith.constant 0 : index
    %14 = vector.load %arg4[%c0_4, %c0_5] : memref<8x32xf32, #tpu.memory_space<vmem>>, vector<8x32xf32>
    %15 = arith.subf %14, %13 : vector<8x32xf32>
    %16 = math.absf %15 : vector<8x32xf32>
    %c0_6 = arith.constant 0 : index
    %c0_7 = arith.constant 0 : index
    %17 = vector.load %arg13[%c0_6, %c0_7] : memref<8x32xf32, #tpu.memory_space<vmem>>, vector<8x32xf32>
    %cst = arith.constant 0.000000e+00 : f32
    %18 = vector.broadcast %cst : f32 to vector<8x32xf32>
    %19 = arith.select %12, %16, %18 : vector<8x32xi1>, vector<8x32xf32>
    %20 = arith.addf %17, %19 : vector<8x32xf32>
    %c0_8 = arith.constant 0 : index
    %c0_9 = arith.constant 0 : index
    %21 = vector.load %arg13[%c0_8, %c0_9] : memref<8x32xf32, #tpu.memory_space<vmem>>, vector<8x32xf32>
    tpu.vector_store %arg13[%c0_8, %c0_9], %20 {strides = array<i32>} : memref<8x32xf32, #tpu.memory_space<vmem>>, vector<8x32xf32>,
    %c0_10 = arith.constant 0 : index
    %c0_11 = arith.constant 0 : index
    %22 = vector.load %arg5[%c0_10, %c0_11] : memref<8x32xf32, #tpu.memory_space<vmem>>, vector<8x32xf32>
    %23 = arith.subf %22, %13 : vector<8x32xf32>
    %24 = math.absf %23 : vector<8x32xf32>
    %c0_12 = arith.constant 0 : index
    %c0_13 = arith.constant 0 : index
    %25 = vector.load %arg13[%c0_12, %c0_13] : memref<8x32xf32, #tpu.memory_space<vmem>>, vector<8x32xf32>
    %cst_14 = arith.constant 0.000000e+00 : f32
    %26 = vector.broadcast %cst_14 : f32 to vector<8x32xf32>
    %27 = arith.select %12, %24, %26 : vector<8x32xi1>, vector<8x32xf32>
    %28 = arith.addf %25, %27 : vector<8x32xf32>
    %c0_15 = arith.constant 0 : index
    %c0_16 = arith.constant 0 : index
    %29 = vector.load %arg13[%c0_15, %c0_16] : memref<8x32xf32, #tpu.memory_space<vmem>>, vector<8x32xf32>
    tpu.vector_store %arg13[%c0_15, %c0_16], %28 {strides = array<i32>} : memref<8x32xf32, #tpu.memory_space<vmem>>, vector<8x32xf32>,
    %c0_17 = arith.constant 0 : index
    %c0_18 = arith.constant 0 : index
    %30 = vector.load %arg6[%c0_17, %c0_18] : memref<8x32xf32, #tpu.memory_space<vmem>>, vector<8x32xf32>
    %31 = arith.subf %30, %13 : vector<8x32xf32>
    %32 = math.absf %31 : vector<8x32xf32>
    %c0_19 = arith.constant 0 : index
    %c0_20 = arith.constant 0 : index
    %33 = vector.load %arg13[%c0_19, %c0_20] : memref<8x32xf32, #tpu.memory_space<vmem>>, vector<8x32xf32>
    %cst_21 = arith.constant 0.000000e+00 : f32
    %34 = vector.broadcast %cst_21 : f32 to vector<8x32xf32>
    %35 = arith.select %12, %32, %34 : vector<8x32xi1>, vector<8x32xf32>
    %36 = arith.addf %33, %35 : vector<8x32xf32>
    %c0_22 = arith.constant 0 : index
    %c0_23 = arith.constant 0 : index
    %37 = vector.load %arg13[%c0_22, %c0_23] : memref<8x32xf32, #tpu.memory_space<vmem>>, vector<8x32xf32>
    tpu.vector_store %arg13[%c0_22, %c0_23], %36 {strides = array<i32>} : memref<8x32xf32, #tpu.memory_space<vmem>>, vector<8x32xf32>,
    %c0_i32_24 = arith.constant 0 : i32
    %38 = arith.cmpi eq, %arg1, %c0_i32_24 : i32
    %39 = arith.extui %38 : i1 to i32
    %c0_i32_25 = arith.constant 0 : i32
    %40 = arith.cmpi ne, %39, %c0_i32_25 : i32
    scf.if %40 {
      %c0_26 = arith.constant 0 : index
      %c0_27 = arith.constant 0 : index
      %41 = vector.load %arg13[%c0_26, %c0_27] : memref<8x32xf32, #tpu.memory_space<vmem>>, vector<8x32xf32>
      %42 = vector.shape_cast %41 : vector<8x32xf32> to vector<1x8x32xf32>
      %cst_28 = arith.constant dense<0.000000e+00> : vector<1xf32>
      %43 = vector.multi_reduction <add>, %42, %cst_28 [1, 2] : vector<1x8x32xf32> to vector<1xf32>
      %44 = vector.shape_cast %43 : vector<1xf32> to vector<1x1x1xf32>
      %45 = vector.extract %44[0, 0, 0] : f32 from vector<1x1x1xf32>
      %c0_29 = arith.constant 0 : index
      %c0_30 = arith.constant 0 : index
      %46 = vector.load %arg9[%c0_29, %c0_30] : memref<2x8xf32, #tpu.memory_space<vmem>>, vector<2x8xf32>
      %cst_31 = arith.constant 5.000000e-01 : f32
      %47 = vector.broadcast %cst_31 : f32 to vector<2x8xf32>
      %48 = arith.cmpf ogt, %46, %47 : vector<2x8xf32>
      %c0_32 = arith.constant 0 : index
      %c0_33 = arith.constant 0 : index
      %49 = vector.load %arg7[%c0_32, %c0_33] : memref<2x8xf32, #tpu.memory_space<vmem>>, vector<2x8xf32>
      %c0_34 = arith.constant 0 : index
      %c0_35 = arith.constant 0 : index
      %50 = vector.load %arg8[%c0_34, %c0_35] : memref<2x8xf32, #tpu.memory_space<vmem>>, vector<2x8xf32>
      %51 = arith.subf %49, %50 : vector<2x8xf32>
      %cst_36 = arith.constant 0.000000e+00 : f32
      %52 = vector.broadcast %cst_36 : f32 to vector<2x8xf32>
      %53 = arith.select %48, %51, %52 : vector<2x8xi1>, vector<2x8xf32>
      %54 = arith.mulf %53, %53 : vector<2x8xf32>
      %55 = vector.shape_cast %54 : vector<2x8xf32> to vector<1x2x8xf32>
      %cst_37 = arith.constant dense<0.000000e+00> : vector<1xf32>
      %56 = vector.multi_reduction <add>, %55, %cst_37 [1, 2] : vector<1x2x8xf32> to vector<1xf32>
      %57 = vector.shape_cast %56 : vector<1xf32> to vector<1x1x1xf32>
      %58 = vector.extract %57[0, 0, 0] : f32 from vector<1x1x1xf32>
      %59 = vector.shape_cast %46 : vector<2x8xf32> to vector<1x2x8xf32>
      %cst_38 = arith.constant dense<0.000000e+00> : vector<1xf32>
      %60 = vector.multi_reduction <add>, %59, %cst_38 [1, 2] : vector<1x2x8xf32> to vector<1xf32>
      %61 = vector.shape_cast %60 : vector<1xf32> to vector<1x1x1xf32>
      %62 = vector.extract %61[0, 0, 0] : f32 from vector<1x1x1xf32>
      %c0_39 = arith.constant 0 : index
      %c0_40 = arith.constant 0 : index
      %63 = vector.load %arg10[%c0_39, %c0_40] : memref<2x4xf32, #tpu.memory_space<vmem>>, vector<2x4xf32>
      %c0_41 = arith.constant 0 : index
      %c0_42 = arith.constant 0 : index
      %64 = vector.load %arg11[%c0_41, %c0_42] : memref<2x4xf32, #tpu.memory_space<vmem>>, vector<2x4xf32>
      %65 = math.log %63 : vector<2x4xf32>
      %cst_43 = arith.constant -1.000000e+02 : f32
      %66 = vector.broadcast %cst_43 : f32 to vector<2x4xf32>
      %67 = arith.maximumf %65, %66 : vector<2x4xf32>
      %cst_44 = arith.constant 1.000000e+00 : f32
      %68 = vector.broadcast %cst_44 : f32 to vector<2x4xf32>
      %69 = arith.subf %68, %63 : vector<2x4xf32>
      %70 = math.log %69 : vector<2x4xf32>
      %cst_45 = arith.constant -1.000000e+02 : f32
      %71 = vector.broadcast %cst_45 : f32 to vector<2x4xf32>
      %72 = arith.maximumf %70, %71 : vector<2x4xf32>
      %73 = arith.mulf %64, %67 : vector<2x4xf32>
      %cst_46 = arith.constant 1.000000e+00 : f32
      %74 = vector.broadcast %cst_46 : f32 to vector<2x4xf32>
      %75 = arith.subf %74, %64 : vector<2x4xf32>
      %76 = arith.mulf %75, %72 : vector<2x4xf32>
      %77 = arith.addf %73, %76 : vector<2x4xf32>
      %cst_47 = arith.constant 0.000000e+00 : f32
      %78 = vector.broadcast %cst_47 : f32 to vector<2x4xf32>
      %79 = arith.subf %78, %77 : vector<2x4xf32>
      %80 = vector.shape_cast %79 : vector<2x4xf32> to vector<1x2x4xf32>
      %cst_48 = arith.constant dense<0.000000e+00> : vector<1xf32>
      %81 = vector.multi_reduction <add>, %80, %cst_48 [1, 2] : vector<1x2x4xf32> to vector<1xf32>
      %82 = vector.shape_cast %81 : vector<1xf32> to vector<1x1x1xf32>
      %83 = vector.extract %82[0, 0, 0] : f32 from vector<1x1x1xf32>
      %84 = tpu.iota {dimensions = array<i32: 0>} : vector<8x128xi32>
      %c0_i32_49 = arith.constant 0 : i32
      %85 = vector.broadcast %c0_i32_49 : i32 to vector<8x128xi32>
      %86 = arith.cmpi eq, %84, %85 : vector<8x128xi32>
      %c1_i32_50 = arith.constant 1 : i32
      %87 = vector.broadcast %c1_i32_50 : i32 to vector<8x128xi32>
      %88 = arith.cmpi eq, %84, %87 : vector<8x128xi32>
      %c2_i32 = arith.constant 2 : i32
      %89 = vector.broadcast %c2_i32 : i32 to vector<8x128xi32>
      %90 = arith.cmpi eq, %84, %89 : vector<8x128xi32>
      %c3_i32 = arith.constant 3 : i32
      %91 = vector.broadcast %c3_i32 : i32 to vector<8x128xi32>
      %92 = arith.cmpi eq, %84, %91 : vector<8x128xi32>
      %cst_51 = arith.constant 0.000000e+00 : f32
      %93 = vector.broadcast %83 : f32 to vector<8x128xf32>
      %94 = vector.broadcast %cst_51 : f32 to vector<8x128xf32>
      %95 = arith.select %92, %93, %94 : vector<8x128xi1>, vector<8x128xf32>
      %96 = vector.broadcast %62 : f32 to vector<8x128xf32>
      %97 = arith.select %90, %96, %95 : vector<8x128xi1>, vector<8x128xf32>
      %98 = vector.broadcast %58 : f32 to vector<8x128xf32>
      %99 = arith.select %88, %98, %97 : vector<8x128xi1>, vector<8x128xf32>
      %100 = vector.broadcast %45 : f32 to vector<8x128xf32>
      %101 = arith.select %86, %100, %99 : vector<8x128xi1>, vector<8x128xf32>
      %c0_52 = arith.constant 0 : index
      %c0_53 = arith.constant 0 : index
      %c0_54 = arith.constant 0 : index
      %102 = vector.load %arg12[%c0_52, %c0_53, %c0_54] : memref<1x8x128xf32, #tpu.memory_space<vmem>>, vector<1x8x128xf32>
      %103 = vector.shape_cast %102 : vector<1x8x128xf32> to vector<8x128xf32>
      %104 = vector.shape_cast %101 : vector<8x128xf32> to vector<1x8x128xf32>
      tpu.vector_store %arg12[%c0_52, %c0_53, %c0_54], %104 {strides = array<i32>} : memref<1x8x128xf32, #tpu.memory_space<vmem>>, vector<1x8x128xf32>,
    } else {
    }
    return
  }
  func.func @transform_0(%arg0: i32, %arg1: i32) -> (i32, i32) {
    %c0_i32 = arith.constant 0 : i32
    %c0_i32_0 = arith.constant 0 : i32
    %c0_i32_1 = arith.constant 0 : i32
    return %c0_i32, %c0_i32_0 : i32, i32
  }
  func.func @transform_1(%arg0: i32, %arg1: i32) -> (i32, i32) {
    %c1_i32 = arith.constant 1 : i32
    %0 = arith.muli %arg0, %c1_i32 : i32
    %1 = arith.addi %0, %arg1 : i32
    %c0_i32 = arith.constant 0 : i32
    %2 = arith.minsi %1, %c0_i32 : i32
    %c0_i32_0 = arith.constant 0 : i32
    %c0_i32_1 = arith.constant 0 : i32
    return %c0_i32_0, %2 : i32, i32
  }
  func.func @transform_2(%arg0: i32, %arg1: i32) -> (i32, i32) {
    %c1_i32 = arith.constant 1 : i32
    %0 = arith.muli %arg0, %c1_i32 : i32
    %1 = arith.addi %0, %arg1 : i32
    %c0_i32 = arith.constant 0 : i32
    %2 = arith.minsi %1, %c0_i32 : i32
    %c0_i32_0 = arith.constant 0 : i32
    %c0_i32_1 = arith.constant 0 : i32
    return %c0_i32_0, %2 : i32, i32
  }
  func.func @transform_3(%arg0: i32, %arg1: i32) -> (i32, i32) {
    %c1_i32 = arith.constant 1 : i32
    %0 = arith.muli %arg0, %c1_i32 : i32
    %1 = arith.addi %0, %arg1 : i32
    %c0_i32 = arith.constant 0 : i32
    %2 = arith.minsi %1, %c0_i32 : i32
    %c0_i32_0 = arith.constant 0 : i32
    %c0_i32_1 = arith.constant 0 : i32
    return %c0_i32_0, %2 : i32, i32
  }
  func.func @transform_4(%arg0: i32, %arg1: i32) -> (i32, i32) {
    %c1_i32 = arith.constant 1 : i32
    %0 = arith.muli %arg0, %c1_i32 : i32
    %1 = arith.addi %0, %arg1 : i32
    %c0_i32 = arith.constant 0 : i32
    %2 = arith.minsi %1, %c0_i32 : i32
    %c0_i32_0 = arith.constant 0 : i32
    %c0_i32_1 = arith.constant 0 : i32
    return %c0_i32_0, %2 : i32, i32
  }
  func.func @transform_5(%arg0: i32, %arg1: i32) -> (i32, i32) {
    %c0_i32 = arith.constant 0 : i32
    %c0_i32_0 = arith.constant 0 : i32
    %c0_i32_1 = arith.constant 0 : i32
    return %c0_i32, %c0_i32_0 : i32, i32
  }
  func.func @transform_6(%arg0: i32, %arg1: i32) -> (i32, i32) {
    %c0_i32 = arith.constant 0 : i32
    %c0_i32_0 = arith.constant 0 : i32
    %c0_i32_1 = arith.constant 0 : i32
    return %c0_i32, %c0_i32_0 : i32, i32
  }
  func.func @transform_7(%arg0: i32, %arg1: i32) -> (i32, i32) {
    %c0_i32 = arith.constant 0 : i32
    %c0_i32_0 = arith.constant 0 : i32
    %c0_i32_1 = arith.constant 0 : i32
    return %c0_i32, %c0_i32_0 : i32, i32
  }
  func.func @transform_8(%arg0: i32, %arg1: i32) -> (i32, i32) {
    %c0_i32 = arith.constant 0 : i32
    %c0_i32_0 = arith.constant 0 : i32
    %c0_i32_1 = arith.constant 0 : i32
    return %c0_i32, %c0_i32_0 : i32, i32
  }
  func.func @transform_9(%arg0: i32, %arg1: i32) -> (i32, i32) {
    %c0_i32 = arith.constant 0 : i32
    %c0_i32_0 = arith.constant 0 : i32
    %c0_i32_1 = arith.constant 0 : i32
    return %c0_i32, %c0_i32_0 : i32, i32
  }
  func.func @transform_10(%arg0: i32, %arg1: i32) -> (i32, i32, i32) {
    %c0_i32 = arith.constant 0 : i32
    %c0_i32_0 = arith.constant 0 : i32
    %c0_i32_1 = arith.constant 0 : i32
    return %arg0, %c0_i32, %c0_i32_0 : i32, i32, i32
  }
}

</mosaic_0001>

<bundles_post_ra>
// kernel: tpu_custom_call.1
= control target key start
LH: loop header
LB: loop body
LE: loop exit
PB: predicated region body
PF: predicated region fallthrough
CT: control target
= control target key end

     0   :  { %15 = vsyncpa [#allocation4], 0  ;;  %s523_s0 = inlined_call_operand.hbm [shape: s32[8,128], index: 0, kind: input, shape index: {}]   ;;  %s524_s1 = inlined_call_operand.hbm [shape: f32[8,32], index: 1, kind: input, shape index: {}]   ;;  %s525_s2 = inlined_call_operand.hbm [shape: f32[8,32], index: 2, kind: input, shape index: {}]   ;;  %s526_s3 = inlined_call_operand.hbm [shape: f32[8,32], index: 3, kind: input, shape index: {}]   ;;  %s527_s4 = inlined_call_operand.hbm [shape: f32[8,32], index: 4, kind: input, shape index: {}]   ;;  %s528_s5 = inlined_call_operand.vmem [shape: f32[2,8], index: 5, kind: input, shape index: {}]   ;;  %s529_s6 = inlined_call_operand.vmem [shape: f32[2,8], index: 6, kind: input, shape index: {}]   ;;  %s530_s7 = inlined_call_operand.vmem [shape: f32[2,8], index: 7, kind: input, shape index: {}]   ;;  %s531_s8 = inlined_call_operand.vmem [shape: f32[2,4], index: 8, kind: input, shape index: {}]   ;;  %s532_s9 = inlined_call_operand.vmem [shape: f32[2,4], index: 9, kind: input, shape index: {}]   ;;  %s533_s10 = inlined_call_operand.hbm [shape: f32[1,8,128], index: 10, kind: output, shape index: {}]  }
   0x1   :  { %16 = vsyncpa [#allocation7], 0 }
   0x2   :  { %17 = vsyncpa [#allocation10], 0 }
   0x3   :  { %18 = vsyncpa [#allocation5], 0  ;;  %s422_s13 = smov [#allocation6]   ;;  %s423_s15 = smov [#allocation9]  }
   0x4   :  { %s40_s14 = sshll.u32 %s422_s13, 4  ;;  %s70_s16 = sshll.u32 %s423_s15, 4  ;;  %s41_s14 = int_to_ptr.vmem [resolvable:$true] %s40_s14  ;;  %s71_s16 = int_to_ptr.vmem [resolvable:$true] %s70_s16 }
   0x5   :  { %s302_s17 = scalar_lea.vmem %s41_s14, 128  ;;  %p307_p1 = scmp.lt.s32.totalorder %s41_s14, %s41_s14 }
   0x6   :  { %p303_p0 = scmp.ne.s32.totalorder %s41_s14, %s302_s17  ;;  %p308_p2 = scmp.lt.s32.totalorder %s302_s17, %s302_s17 }
   0x8   :  { %p309_p3 = por %p308_p2, %p307_p1 }
   0xa   :  { %p310_p4 = pnand %p309_p3, %p303_p0 }
   0xc   :  { %313 = shalt.err (!%p310_p4)
}
   0xd   :  { %43 = dma.hbm_to_vmem [thread:$0]  %s524_s1, 128, %s41_s14, [#allocation7]  }
   0xe   :  { %s322_s20 = scalar_lea.vmem %s71_s16, 128  ;;  %p327_p6 = scmp.lt.s32.totalorder %s71_s16, %s71_s16 }
   0xf   :  { %p323_p5 = scmp.ne.s32.totalorder %s71_s16, %s322_s20  ;;  %p328_p7 = scmp.lt.s32.totalorder %s322_s20, %s322_s20 }
  0x11   :  { %p329_p8 = por %p328_p7, %p327_p6 }
  0x13   :  { %p330_p9 = pnand %p329_p8, %p323_p5 }
  0x15   :  { %333 = shalt.err (!%p330_p9)
}
  0x16   :  { %73 = dma.hbm_to_vmem [thread:$0]  %s526_s3, 128, %s71_s16, [#allocation10]  }
  0x17   :  { %s424_s23 = smov [#allocation3]   ;;  %s425_s25 = smov [#allocation8]  }
  0x18   :  { %s25_s24 = sshll.u32 %s424_s23, 4  ;;  %s55_s26 = sshll.u32 %s425_s25, 4  ;;  %s26_s24 = int_to_ptr.vmem [resolvable:$true] %s25_s24  ;;  %s56_s26 = int_to_ptr.vmem [resolvable:$true] %s55_s26 }
  0x19   :  { %s342_s27 = scalar_lea.vmem %s26_s24, 128  ;;  %p347_p11 = scmp.lt.s32.totalorder %s26_s24, %s26_s24 }
  0x1a   :  { %p343_p10 = scmp.ne.s32.totalorder %s26_s24, %s342_s27  ;;  %p348_p12 = scmp.lt.s32.totalorder %s342_s27, %s342_s27 }
  0x1c   :  { %p349_p13 = por %p348_p12, %p347_p11 }
  0x1e   :  { %p350_p0 = pnand %p349_p13, %p343_p10 }
  0x20   :  { %353 = shalt.err (!%p350_p0)
}
  0x21   :  { %28 = dma.hbm_to_vmem [thread:$0]  %s523_s0, 128, %s26_s24, [#allocation4]  }
  0x22   :  { %s362_s29 = scalar_lea.vmem %s56_s26, 128  ;;  %p367_p2 = scmp.lt.s32.totalorder %s56_s26, %s56_s26 }
  0x23   :  { %p363_p1 = scmp.ne.s32.totalorder %s56_s26, %s362_s29  ;;  %p368_p3 = scmp.lt.s32.totalorder %s362_s29, %s362_s29 }
  0x25   :  { %p369_p4 = por %p368_p3, %p367_p2 }
  0x27   :  { %p370_p5 = pnand %p369_p4, %p363_p1 }
  0x29   :  { %373 = shalt.err (!%p370_p5)
}
  0x2a   :  { %58 = dma.hbm_to_vmem [thread:$0]  %s525_s2, 128, %s56_s26, [#allocation7]  }
  0x2b   :  { %s426_s11 = smov [#allocation11]  }
  0x2c   :  { %s85_s12 = sshll.u32 %s426_s11, 4  ;;  %s86_s12 = int_to_ptr.vmem [resolvable:$true] %s85_s12 }
  0x2d   :  { %s382_s13 = scalar_lea.vmem %s86_s12, 128  ;;  %p387_p7 = scmp.lt.s32.totalorder %s86_s12, %s86_s12 }
  0x2e   :  { %p383_p6 = scmp.ne.s32.totalorder %s86_s12, %s382_s13  ;;  %p388_p8 = scmp.lt.s32.totalorder %s382_s13, %s382_s13 }
  0x30   :  { %p389_p9 = por %p388_p8, %p387_p7 }
  0x32   :  { %p390_p10 = pnand %p389_p9, %p383_p6 }
  0x34   :  { %393 = shalt.err (!%p390_p10)
}
  0x35   :  { %88 = dma.hbm_to_vmem [thread:$0]  %s527_s4, 128, %s86_s12, [#allocation10]  }
  0x36   :  { %414 = dma.done.wait [#allocation4], 128  }
  0x37   :  { %415 = vsyncadd [#allocation4], 4294967168 }
  0x38   :  { %416 = dma.done.wait [#allocation7], 256  }
  0x39   :  { %417 = vsyncadd [#allocation7], 4294967040 }
  0x3a   :  { %418 = dma.done.wait [#allocation10], 256  }
  0x3b   :  { %419 = vsyncadd [#allocation10], 4294967040  ;;  %vm130_vm0 = vcmask 261120   ;;  %v427_v0 = vmov 0   ;;  %v428_v1 = vmov 0.0   ;;  %v138_v2 = vld [vmem:[#allocation3] sm:$0xff]  ;;  %v134_v28 = vlaneseq }
  0x3c   :  { %289 = vset.pattern.permute.xlu0 %v427_v0  ;;  %131 = vst.msk [vmem:[#allocation2] sm:$0xff] %vm130_vm0, %v428_v1  ;;  %v208_v3 = vld [vmem:[%s531_s8] sm:$0x3]  ;;  %vm187_vm2 = vcmask 58368   ;;  %vm222_vm3 = vcmask 25600   ;;  %v143_v26 = vld [vmem:[#allocation6] sm:$0xff] }
  0x3d   :  { %140 = vperm.xlu0 %289, %v138_v2   ;;  %290 = vlog2.f32 %v208_v3  ;;  %v213_v4 = vsub.f32 1.0, %v208_v3  ;;  %v182_v5 = vld [vmem:[%s528_s5] sm:$0x3]  ;;  %v144_v27 = vld [vmem:[#allocation8] sm:$0xff]  ;;  %v135_v30 = vand.u32 127, %v134_v28  ;;  %v159_v39 = vld [vmem:[#allocation11] sm:$0xff] }
  0x3e   :  { %v183_v6 = vld [vmem:[%s529_s6] sm:$0x3]  ;;  %v145_v29 = vsub.f32 %v144_v27, %v143_v26  ;;  %v160_v43 = vsub.f32 %v159_v39, %v143_v26  ;;  %s429_s22 = smov [#allocation12]  }
  0x3f   :  { %292 = vlog2.f32 %v213_v4  ;;  %v180_v7 = vld [vmem:[%s530_s7] sm:$0x3]  ;;  %v184_v8 = vsub.f32 %v182_v5, %v183_v6  ;;  %s254_s23 = sshll.u32 %s429_s22, 4  ;;  %s255_s23 = int_to_ptr.vmem [resolvable:$true] %s254_s23 }
  0x40   :  { %vm181_vm1 = vcmp.gt.f32.partialorder %v180_v7, 0.5  ;;  %v209_v13 = vld [vmem:[%s532_s9] sm:$0x3]  ;;  %v198_v16 = vsel %vm187_vm2, %v180_v7, 0.0  ;;  %v146_v31 = vand.u32 2147483647, %v145_v29  ;;  %p399_p12 = scmp.lt.s32.totalorder %s255_s23, %s255_s23 }
  0x41   :  { %v185_v9 = vsel %vm181_vm1, %v184_v8, 0.0  ;;  %v218_v19 = vsub.f32 1.0, %v209_v13  ;;  %v152_v34 = vld [vmem:[#allocation9] sm:$0xff]  ;;  %v161_v44 = vand.u32 2147483647, %v160_v43  ;;  %s394_s24 = scalar_lea.vmem %s255_s23, 128 }
  0x42   :  { %v186_v10 = vmul.f32 %v185_v9, %v185_v9  ;;  %v153_v37 = vsub.f32 %v152_v34, %v143_v26  ;;  %p395_p11 = scmp.ne.s32.totalorder %s255_s23, %s394_s24  ;;  %p400_p13 = scmp.lt.s32.totalorder %s394_s24, %s394_s24 }
  0x43   :  { %v147_v33 = vld [vmem:[#allocation2] sm:$0xff] }
  0x44   :  { %v188_v11 = vsel %vm187_vm2, %v186_v10, 0.0  ;;  %v154_v38 = vand.u32 2147483647, %v153_v37  ;;  %p401_p0 = por %p400_p13, %p399_p12 }
  0x45   :  { %189 = vadd.xlane.f32.xlu1 %v188_v11 }
  0x46   :  { %p402_p1 = pnand %p401_p0, %p395_p11 }
  0x49   :  { %199 = vadd.xlane.f32.xlu1 %v198_v16 }
  0x4a   :  { %v291_v12 = vpop.eup %290 }
  0x4b   :  { %v211_v14 = vmul.f32 0.6931472, %v291_v12 }
  0x4c   :  { %v293_v15 = vpop.eup %292 }
  0x4d   :  { %v212_v17 = vmax.f32 %v211_v14, -100.0  ;;  %v215_v18 = vmul.f32 0.6931472, %v293_v15  ;;  %v234_v14 = vshrl.u32 %v134_v28, 7 }
  0x4f   :  { %v216_v20 = vmax.f32 %v215_v18, -100.0  ;;  %v217_v21 = vmul.f32 %v212_v17, %v209_v13  ;;  %vm238_vm5 = vcmp.eq.s32.totalorder %v234_v14, 3  ;;  %vm237_vm6 = vcmp.eq.s32.totalorder %v234_v14, 2 }
  0x50   :  { %vm236_vm7 = vcmp.eq.s32.totalorder %v234_v14, 1  ;;  %vm235_vm8 = vcmp.eq.s32.totalorder %v234_v14, 0 }
  0x51   :  { %v219_v22 = vmul.f32 %v218_v19, %v216_v20 }
  0x53   :  { %v220_v23 = vadd.f32 %v219_v22, %v217_v21 }
  0x55   :  { %v221_v24 = vsub.f32 0.0, %v220_v23 }
  0x57   :  { %v223_v25 = vsel %vm222_vm3, %v221_v24, 0.0 }
  0x58   :  { %224 = vadd.xlane.f32.xlu1 %v223_v25 }
  0xb8   :  { %v141_v32 = vpop.permute.xlu0 %140 }
  0xb9   :  { %vm142_vm4 = vcmp.lt.s32.totalorder %v135_v30, %v141_v32 }
  0xba   :  { %v148_v35 = vsel %vm142_vm4, %v146_v31, 0.0  ;;  %v156_v41 = vsel %vm142_vm4, %v154_v38, 0.0  ;;  %v163_v46 = vsel %vm142_vm4, %v161_v44, 0.0 }
  0xbb   :  { %v149_v36 = vadd.f32 %v148_v35, %v147_v33 }
  0xbd   :  { %151 = vst.msk [vmem:[#allocation2] sm:$0xff] %vm130_vm0, %v149_v36 }
  0xc4   :  { %v155_v40 = vld [vmem:[#allocation2] sm:$0xff] }
  0xc5   :  { %v157_v42 = vadd.f32 %v156_v41, %v155_v40 }
  0xc7   :  { %158 = vst.msk [vmem:[#allocation2] sm:$0xff] %vm130_vm0, %v157_v42 }
  0xce   :  { %v162_v45 = vld [vmem:[#allocation2] sm:$0xff]  ;;  %v190_v50 = vpop.xlane.xlu1 %189 }
  0xcf   :  { %v164_v47 = vadd.f32 %v163_v46, %v162_v45  ;;  %v191_v53 = vrot.slane %v190_v50, 4 }
  0xd1   :  { %165 = vst.msk [vmem:[#allocation2] sm:$0xff] %vm130_vm0, %v164_v47  ;;  %v192_v56 = vadd.f32 %v191_v53, %v190_v50 }
  0xd2   :  { %v200_v51 = vpop.xlane.xlu1 %199 }
  0xd3   :  { %v201_v54 = vrot.slane %v200_v51, 4  ;;  %v193_v59 = vrot.slane %v192_v56, 2 }
  0xd5   :  { %v202_v57 = vadd.f32 %v201_v54, %v200_v51  ;;  %v194_v1 = vadd.f32 %v193_v59, %v192_v56 }
  0xd7   :  { %v203_v61 = vrot.slane %v202_v57, 2  ;;  %v195_v6 = vrot.slane %v194_v1, 1 }
  0xd8   :  { %v169_v48 = vld [vmem:[#allocation2] sm:$0xff] }
  0xd9   :  { %v170_v49 = vsel %vm130_vm0, %v169_v48, 0.0  ;;  %v204_v3 = vadd.f32 %v203_v61, %v202_v57  ;;  %v196_v11 = vadd.f32 %v195_v6, %v194_v1 }
  0xda   :  { %171 = vadd.xlane.f32.xlu0 %v170_v49 }
  0xdb   :  { %v205_v8 = vrot.slane %v204_v3, 1 }
  0xdd   :  { %v206_v12 = vadd.f32 %v205_v8, %v204_v3 }
  0xe1   :  { %v225_v52 = vpop.xlane.xlu1 %224 }
  0xe2   :  { %v226_v55 = vrot.slane %v225_v52, 4 }
  0xe4   :  { %v227_v58 = vadd.f32 %v226_v55, %v225_v52 }
  0xe6   :  { %v228_v63 = vrot.slane %v227_v58, 2 }
  0xe8   :  { %v229_v4 = vadd.f32 %v228_v63, %v227_v58 }
  0xea   :  { %v230_v9 = vrot.slane %v229_v4, 1 }
  0xec   :  { %v231_v13 = vadd.f32 %v230_v9, %v229_v4 }
 0x163   :  { %v172_v60 = vpop.xlane.xlu0 %171 }
 0x164   :  { %v173_v62 = vrot.slane %v172_v60, 4 }
 0x166   :  { %v174_v0 = vadd.f32 %v173_v62, %v172_v60 }
 0x168   :  { %v175_v2 = vrot.slane %v174_v0, 2 }
 0x16a   :  { %v176_v5 = vadd.f32 %v175_v2, %v174_v0 }
 0x16c   :  { %v177_v7 = vrot.slane %v176_v5, 1 }
 0x16e   :  { %v178_v10 = vadd.f32 %v177_v7, %v176_v5 }
 0x170   :  { %273 = vpush %v178_v10 }
 0x171   :  { %275 = vpush %v196_v11 }
 0x172   :  { %277 = vpush %v206_v12 }
 0x173   :  { %279 = vpush %v231_v13 }
 0x1a1   :  { %s274_s5 = spop %273 }
 0x1a2   :  { %s276_s6 = spop %275  ;;  %v245_v20 = vstv %s274_s5 }
 0x1a3   :  { %s278_s7 = spop %277  ;;  %v243_v18 = vstv %s276_s6 }
 0x1a4   :  { %v241_v15 = vstv %s278_s7  ;;  %s280_s9 = spop %279 }
 0x1a5   :  { %v239_v16 = vstv %s280_s9 }
 0x1a6   :  { %v240_v17 = vsel %vm238_vm5, %v239_v16, 0.0 }
 0x1a7   :  { %v242_v19 = vsel %vm237_vm6, %v241_v15, %v240_v17 }
 0x1a8   :  { %v244_v21 = vsel %vm236_vm7, %v243_v18, %v242_v19 }
 0x1a9   :  { %v246_v22 = vsel %vm235_vm8, %v245_v20, %v244_v21 }
 0x1aa   :  { %247 = vst [vmem:[#allocation12] sm:$0xff] %v246_v22 }
 0x1ab   :  { %405 = shalt.err (!%p402_p1)
}
 0x1ac   :  { %257 = dma.vmem_to_hbm [thread:$0]  %s255_s23, 128, %s533_s10, [#allocation5]  }
 0x1ad   :  { %420 = dma.done.wait [#allocation5], 128  }
 0x1ae   :  { %421 = vsyncadd [#allocation5], 4294967168 }
 0x1af   :  { %261 = vsyncpa [#allocation4], 1 }
 0x1b0   :  { %262 = vsyncpa [#allocation7], 1 }
 0x1b1   :  { %263 = vsyncpa [#allocation10], 1 }
 0x1b2   :  { %264 = vsyncpa [#allocation5], 1 }

</bundles_post_ra>
